<compile_context>
chip_gen: v5e
topology: v5e:2x2
jax: 0.10.0
libtpu: 0.0.40
codegen_flags: <defaults>
</compile_context>

<pallas_src>
import jax
import jax.numpy as jnp
import numpy as np
from jax.experimental import pallas as pl
from jax.experimental.pallas import tpu as pltpu

WEEKDAY_VOCAB, WEEKDAY_DIM = 7, 3
START_VOCAB, START_DIM = 48, 6
SEMPT_VOCAB, SEMPT_DIM = 9, 3
SEM_O_DIM, MAP_DIM = 8, 3
SEM_DIM = WEEKDAY_DIM + START_DIM + MAP_DIM            # 12  (== sem_dim())
N_SCALARS = 5                                          # lng, lat, dis, spd, azi
PT_OFF = N_SCALARS + SEM_DIM                           # 17
OUT_DIM = PT_OFF + SEMPT_DIM                           # 20  (== end_dim())


# --------------------------------------------------------------------------
# Per-point assembly kernel: one (tile_b, OUT_DIM, tile_t) channels-first block.
# --------------------------------------------------------------------------
def _point_kernel(pt_tab_ref,                          # SMEM (9, 3) f32 (scalar-prefetched)
                  sem_ref,                             # VMEM (tile_b, SEM_DIM) f32
                  lngs_ref, lats_ref, dis_ref, spd_ref, azi_ref,  # VMEM (tile_b, tile_t) f32
                  ids_ref,                             # VMEM (tile_b, tile_t) int32
                  out_ref):                            # VMEM (tile_b, OUT_DIM, tile_t) f32
    f32 = jnp.float32
    tile_b, tile_t = lngs_ref.shape

    # 1) Raw location / driving-status scalars: full-lane store per channel.
    out_ref[:, 0:1, :] = lngs_ref[...][:, None, :]
    out_ref[:, 1:2, :] = lats_ref[...][:, None, :]
    out_ref[:, 2:3, :] = dis_ref[...][:, None, :]
    out_ref[:, 3:4, :] = spd_ref[...][:, None, :]
    out_ref[:, 4:5, :] = azi_ref[...][:, None, :]

    # 2) Per-trajectory spatiotemporal semantics broadcast over time (lanes).
    sem = sem_ref[...]                                                  # (tile_b, 12)
    out_ref[:, N_SCALARS:PT_OFF, :] = jnp.broadcast_to(
        sem[:, :, None], (tile_b, SEM_DIM, tile_t))

    # 3) Per-point semantic embedding (nn.Embedding(9, 3, padding_idx=0)),
    #    channels-first via VPU compare/select against SMEM table scalars.
    ids = ids_ref[...]                                                  # (tile_b, tile_t)
    for d in range(SEMPT_DIM):
        ch = jnp.zeros((tile_b, tile_t), f32)
        for v in range(SEMPT_VOCAB):                                    # ids outside [0,9) -> 0
            ch = jnp.where(ids == v, pt_tab_ref[v, d], ch)
        out_ref[:, PT_OFF + d:PT_OFF + d + 1, :] = ch[:, None, :]


def _pick_tile(n: int, unit: int, max_tile: int) -> int:
    """Largest multiple of `unit` that divides n and is <= max_tile, else n (full extent)."""
    cand = (min(max_tile, n) // unit) * unit
    while cand >= unit:
        if n % cand == 0:
            return cand
        cand -= unit
    return n  # full extent (legal even if not a multiple of unit)


# --------------------------------------------------------------------------
# Wrapper (mirrors Input_Module.forward; returns (input_tensor, traj, traj_semantic)).
# --------------------------------------------------------------------------
def input_module_forward(attr, traj, params):
    f32 = jnp.float32
    lngs = traj["lngs"].astype(f32)
    lats = traj["lats"].astype(f32)
    dis = traj["travel_dis"].astype(f32)
    spd = traj["spd"].astype(f32)
    azi = traj["azimuth"].astype(f32)
    ids = traj["sem_pt"].astype(jnp.int32)
    B, T = lngs.shape

    # Attribute-level semantics: O(B) work (2 gathers + (B,8)@(8,3) matmul),
    # computed with plain XLA per the perf review and fed to the point kernel.
    wd_emb = jnp.take(params["weekday_embed"], attr["weekday"].astype(jnp.int32), axis=0)
    st_emb = jnp.take(params["start_time_embed"], attr["start_time"].astype(jnp.int32), axis=0)
    sem_map = jnp.dot(attr["sem_O"].astype(f32), params["map_w"])
    traj_sem = jnp.concatenate([wd_emb, st_emb, sem_map], axis=1).astype(f32)   # (B, 12)

    tile_b = _pick_tile(B, 8, 8)          # multiple of 8 (or full B)
    tile_t = _pick_tile(T, 128, 1024)     # multiple of 128 (or full T)
    grid = (B // tile_b, T // tile_t)

    bt_map = lambda b, t, tab: (b, t)
    bt_spec = pl.BlockSpec((tile_b, tile_t), bt_map)

    out_cf = pl.pallas_call(
        _point_kernel,
        out_shape=jax.ShapeDtypeStruct((B, OUT_DIM, T), f32),
        grid_spec=pltpu.PrefetchScalarGridSpec(
            num_scalar_prefetch=1,                       # sem_pt embedding table -> SMEM
            grid=grid,
            in_specs=[
                pl.BlockSpec((tile_b, SEM_DIM), lambda b, t, tab: (b, 0)),
                bt_spec, bt_spec, bt_spec, bt_spec, bt_spec,   # five scalar streams
                bt_spec,                                       # sem_pt ids
            ],
            out_specs=pl.BlockSpec((tile_b, OUT_DIM, tile_t),
                                   lambda b, t, tab: (b, 0, t)),
        ),
        compiler_params=pltpu.CompilerParams(
            dimension_semantics=("parallel", "parallel")),
    )(params["sem_pt_embed"], traj_sem, lngs, lats, dis, spd, azi, ids)

    # Recover the module's channels-last layout with one wrapper transpose.
    # TODO(synk): downstream consumers could take the channels-first (B, 20, T)
    # tensor directly and skip this transpose entirely.
    input_tensor = jnp.transpose(out_cf, (0, 2, 1))               # (B, T, OUT_DIM)
    return input_tensor, traj, traj_sem


def init_params(key):
    k1, k2, k3, k4 = jax.random.split(key, 4)
    weekday_embed = jax.random.normal(k1, (WEEKDAY_VOCAB, WEEKDAY_DIM), jnp.float32)
    start_time_embed = jax.random.normal(k2, (START_VOCAB, START_DIM), jnp.float32)
    sem_pt_embed = jax.random.normal(k3, (SEMPT_VOCAB, SEMPT_DIM), jnp.float32)
    sem_pt_embed = sem_pt_embed.at[0].set(0.0)  # nn.Embedding padding_idx=0
    bound = 1.0 / np.sqrt(SEM_O_DIM)
    # nn.Linear(8, 3, bias=False) weight is (3, 8); stored transposed as (8, 3) for x @ W.
    map_w = jax.random.uniform(k4, (SEM_O_DIM, MAP_DIM), jnp.float32, -bound, bound)
    return {
        "weekday_embed": weekday_embed,
        "start_time_embed": start_time_embed,
        "sem_pt_embed": sem_pt_embed,
        "map_w": map_w,
    }


def reference_forward(attr, traj, params):
    """Pure-JAX reference matching the PyTorch forward semantics."""
    wd_emb = params["weekday_embed"][attr["weekday"]]
    st_emb = params["start_time_embed"][attr["start_time"]]
    sem_map = attr["sem_O"] @ params["map_w"]
    traj_sem = jnp.concatenate([wd_emb, st_emb, sem_map], axis=1)
    B, T = traj["lngs"].shape
    exp_sem = jnp.broadcast_to(traj_sem[:, None, :], (B, T, traj_sem.shape[-1]))
    pt_emb = params["sem_pt_embed"][traj["sem_pt"]]
    input_tensor = jnp.concatenate(
        [traj["lngs"][..., None], traj["lats"][..., None],
         traj["travel_dis"][..., None], traj["spd"][..., None],
         traj["azimuth"][..., None], exp_sem, pt_emb], axis=2)
    return input_tensor, traj_sem


def _make_inputs(key, B, T):
    ks = jax.random.split(key, 9)
    attr = {
        "weekday": jax.random.randint(ks[0], (B,), 0, WEEKDAY_VOCAB, dtype=jnp.int32),
        "start_time": jax.random.randint(ks[1], (B,), 0, START_VOCAB, dtype=jnp.int32),
        "sem_O": jax.random.normal(ks[2], (B, SEM_O_DIM), jnp.float32),
    }
    traj = {
        "lngs": jax.random.normal(ks[3], (B, T), jnp.float32),
        "lats": jax.random.normal(ks[4], (B, T), jnp.float32),
        "travel_dis": jax.random.uniform(ks[5], (B, T), jnp.float32),
        "spd": jax.random.uniform(ks[6], (B, T), jnp.float32),
        "azimuth": jax.random.uniform(ks[7], (B, T), jnp.float32, 0.0, 360.0),
        "sem_pt": jax.random.randint(ks[8], (B, T), 0, SEMPT_VOCAB, dtype=jnp.int32),
    }
    return attr, traj


if __name__ == "__main__":
    key = jax.random.PRNGKey(0)
    kp, k_small, k_big = jax.random.split(key, 3)
    params = init_params(kp)

    # Primary small case (module-consistent shapes).
    B, T = 2, 8
    attr, traj = _make_inputs(k_small, B, T)
    input_tensor, traj_out, traj_semantic = input_module_forward(attr, traj, params)
    jax.block_until_ready((input_tensor, traj_semantic))
    ref_input, ref_sem = reference_forward(attr, traj, params)
    assert input_tensor.shape == (B, T, OUT_DIM)
    assert traj_semantic.shape == (B, SEM_DIM)
    np.testing.assert_allclose(np.asarray(input_tensor), np.asarray(ref_input),
                               rtol=1e-5, atol=1e-5)
    np.testing.assert_allclose(np.asarray(traj_semantic), np.asarray(ref_sem),
                               rtol=1e-5, atol=1e-5)

    # Secondary case exercising the tiled grid (tile_b=8, tile_t=1024, grid=(2, 2)).
    B2, T2 = 16, 2048
    attr2, traj2 = _make_inputs(k_big, B2, T2)
    input2, _, sem2 = input_module_forward(attr2, traj2, params)
    jax.block_until_ready((input2, sem2))
    ref_input2, ref_sem2 = reference_forward(attr2, traj2, params)
    np.testing.assert_allclose(np.asarray(input2), np.asarray(ref_input2),
                               rtol=1e-5, atol=1e-5)
    np.testing.assert_allclose(np.asarray(sem2), np.asarray(ref_sem2),
                               rtol=1e-5, atol=1e-5)

    print("KERNEL_OK")
</pallas_src>

<mosaic_0001>
module attributes {stable_mosaic.version = 11 : i64} {
  func.func @_point_kernel(%arg0: i32, %arg1: i32, %arg2: memref<9x3xf32, #tpu.memory_space<smem>>, %arg3: memref<2x12xf32, #tpu.memory_space<vmem>>, %arg4: memref<2x8xf32, #tpu.memory_space<vmem>>, %arg5: memref<2x8xf32, #tpu.memory_space<vmem>>, %arg6: memref<2x8xf32, #tpu.memory_space<vmem>>, %arg7: memref<2x8xf32, #tpu.memory_space<vmem>>, %arg8: memref<2x8xf32, #tpu.memory_space<vmem>>, %arg9: memref<2x8xi32, #tpu.memory_space<vmem>>, %arg10: memref<2x20x8xf32, #tpu.memory_space<vmem>>) attributes {dimension_semantics = [#tpu.dimension_semantics<parallel>, #tpu.dimension_semantics<parallel>], iteration_bounds = array<i64: 1, 1>, scalar_prefetch = 1 : i64, scratch_operands = 0 : i64, tpu.core_type = #tpu.core_type<tc>, window_params = [{transform_indices = @transform_0, window_bounds = array<i64: 2, 12>}, {transform_indices = @transform_1, window_bounds = array<i64: 2, 8>}, {transform_indices = @transform_2, window_bounds = array<i64: 2, 8>}, {transform_indices = @transform_3, window_bounds = array<i64: 2, 8>}, {transform_indices = @transform_4, window_bounds = array<i64: 2, 8>}, {transform_indices = @transform_5, window_bounds = array<i64: 2, 8>}, {transform_indices = @transform_6, window_bounds = array<i64: 2, 8>}, {transform_indices = @transform_7, window_bounds = array<i64: 2, 20, 8>}]} {
    %c0 = arith.constant 0 : index
    %c0_0 = arith.constant 0 : index
    %0 = vector.load %arg4[%c0, %c0_0] : memref<2x8xf32, #tpu.memory_space<vmem>>, vector<2x8xf32>
    %1 = vector.shape_cast %0 : vector<2x8xf32> to vector<2x1x8xf32>
    %c0_1 = arith.constant 0 : index
    %c0_2 = arith.constant 0 : index
    %c0_3 = arith.constant 0 : index
    %2 = vector.load %arg10[%c0_1, %c0_2, %c0_3] : memref<2x20x8xf32, #tpu.memory_space<vmem>>, vector<2x1x8xf32>
    tpu.vector_store %arg10[%c0_1, %c0_2, %c0_3], %1 {strides = array<i32>} : memref<2x20x8xf32, #tpu.memory_space<vmem>>, vector<2x1x8xf32>,
    %c0_4 = arith.constant 0 : index
    %c0_5 = arith.constant 0 : index
    %3 = vector.load %arg5[%c0_4, %c0_5] : memref<2x8xf32, #tpu.memory_space<vmem>>, vector<2x8xf32>
    %4 = vector.shape_cast %3 : vector<2x8xf32> to vector<2x1x8xf32>
    %c0_6 = arith.constant 0 : index
    %c1 = arith.constant 1 : index
    %c0_7 = arith.constant 0 : index
    %5 = vector.load %arg10[%c0_6, %c1, %c0_7] : memref<2x20x8xf32, #tpu.memory_space<vmem>>, vector<2x1x8xf32>
    tpu.vector_store %arg10[%c0_6, %c1, %c0_7], %4 {strides = array<i32>} : memref<2x20x8xf32, #tpu.memory_space<vmem>>, vector<2x1x8xf32>,
    %c0_8 = arith.constant 0 : index
    %c0_9 = arith.constant 0 : index
    %6 = vector.load %arg6[%c0_8, %c0_9] : memref<2x8xf32, #tpu.memory_space<vmem>>, vector<2x8xf32>
    %7 = vector.shape_cast %6 : vector<2x8xf32> to vector<2x1x8xf32>
    %c0_10 = arith.constant 0 : index
    %c2 = arith.constant 2 : index
    %c0_11 = arith.constant 0 : index
    %8 = vector.load %arg10[%c0_10, %c2, %c0_11] : memref<2x20x8xf32, #tpu.memory_space<vmem>>, vector<2x1x8xf32>
    tpu.vector_store %arg10[%c0_10, %c2, %c0_11], %7 {strides = array<i32>} : memref<2x20x8xf32, #tpu.memory_space<vmem>>, vector<2x1x8xf32>,
    %c0_12 = arith.constant 0 : index
    %c0_13 = arith.constant 0 : index
    %9 = vector.load %arg7[%c0_12, %c0_13] : memref<2x8xf32, #tpu.memory_space<vmem>>, vector<2x8xf32>
    %10 = vector.shape_cast %9 : vector<2x8xf32> to vector<2x1x8xf32>
    %c0_14 = arith.constant 0 : index
    %c3 = arith.constant 3 : index
    %c0_15 = arith.constant 0 : index
    %11 = vector.load %arg10[%c0_14, %c3, %c0_15] : memref<2x20x8xf32, #tpu.memory_space<vmem>>, vector<2x1x8xf32>
    tpu.vector_store %arg10[%c0_14, %c3, %c0_15], %10 {strides = array<i32>} : memref<2x20x8xf32, #tpu.memory_space<vmem>>, vector<2x1x8xf32>,
    %c0_16 = arith.constant 0 : index
    %c0_17 = arith.constant 0 : index
    %12 = vector.load %arg8[%c0_16, %c0_17] : memref<2x8xf32, #tpu.memory_space<vmem>>, vector<2x8xf32>
    %13 = vector.shape_cast %12 : vector<2x8xf32> to vector<2x1x8xf32>
    %c0_18 = arith.constant 0 : index
    %c4 = arith.constant 4 : index
    %c0_19 = arith.constant 0 : index
    %14 = vector.load %arg10[%c0_18, %c4, %c0_19] : memref<2x20x8xf32, #tpu.memory_space<vmem>>, vector<2x1x8xf32>
    tpu.vector_store %arg10[%c0_18, %c4, %c0_19], %13 {strides = array<i32>} : memref<2x20x8xf32, #tpu.memory_space<vmem>>, vector<2x1x8xf32>,
    %c0_20 = arith.constant 0 : index
    %c0_21 = arith.constant 0 : index
    %15 = vector.load %arg3[%c0_20, %c0_21] : memref<2x12xf32, #tpu.memory_space<vmem>>, vector<2x12xf32>
    %16 = vector.shape_cast %15 : vector<2x12xf32> to vector<2x12x1xf32>
    %17 = vector.shape_cast %16 : vector<2x12x1xf32> to vector<2x12x1xf32>
    %18 = vector.broadcast %17 : vector<2x12x1xf32> to vector<2x12x8xf32>
    %c0_22 = arith.constant 0 : index
    %c5 = arith.constant 5 : index
    %c0_23 = arith.constant 0 : index
    %19 = vector.load %arg10[%c0_22, %c5, %c0_23] : memref<2x20x8xf32, #tpu.memory_space<vmem>>, vector<2x12x8xf32>
    tpu.vector_store %arg10[%c0_22, %c5, %c0_23], %18 {strides = array<i32>} : memref<2x20x8xf32, #tpu.memory_space<vmem>>, vector<2x12x8xf32>,
    %c0_24 = arith.constant 0 : index
    %c0_25 = arith.constant 0 : index
    %20 = vector.load %arg9[%c0_24, %c0_25] : memref<2x8xi32, #tpu.memory_space<vmem>>, vector<2x8xi32>
    %cst = arith.constant 0.000000e+00 : f32
    %21 = vector.broadcast %cst : f32 to vector<2x8xf32>
    %c0_i32 = arith.constant 0 : i32
    %22 = vector.broadcast %c0_i32 : i32 to vector<2x8xi32>
    %23 = arith.cmpi eq, %20, %22 : vector<2x8xi32>
    %c0_26 = arith.constant 0 : index
    %c0_27 = arith.constant 0 : index
    %24 = memref.load %arg2[%c0_26, %c0_27] : memref<9x3xf32, #tpu.memory_space<smem>>
    %25 = vector.broadcast %24 : f32 to vector<2x8xf32>
    %26 = arith.select %23, %25, %21 : vector<2x8xi1>, vector<2x8xf32>
    %c1_i32 = arith.constant 1 : i32
    %27 = vector.broadcast %c1_i32 : i32 to vector<2x8xi32>
    %28 = arith.cmpi eq, %20, %27 : vector<2x8xi32>
    %c1_28 = arith.constant 1 : index
    %c0_29 = arith.constant 0 : index
    %29 = memref.load %arg2[%c1_28, %c0_29] : memref<9x3xf32, #tpu.memory_space<smem>>
    %30 = vector.broadcast %29 : f32 to vector<2x8xf32>
    %31 = arith.select %28, %30, %26 : vector<2x8xi1>, vector<2x8xf32>
    %c2_i32 = arith.constant 2 : i32
    %32 = vector.broadcast %c2_i32 : i32 to vector<2x8xi32>
    %33 = arith.cmpi eq, %20, %32 : vector<2x8xi32>
    %c2_30 = arith.constant 2 : index
    %c0_31 = arith.constant 0 : index
    %34 = memref.load %arg2[%c2_30, %c0_31] : memref<9x3xf32, #tpu.memory_space<smem>>
    %35 = vector.broadcast %34 : f32 to vector<2x8xf32>
    %36 = arith.select %33, %35, %31 : vector<2x8xi1>, vector<2x8xf32>
    %c3_i32 = arith.constant 3 : i32
    %37 = vector.broadcast %c3_i32 : i32 to vector<2x8xi32>
    %38 = arith.cmpi eq, %20, %37 : vector<2x8xi32>
    %c3_32 = arith.constant 3 : index
    %c0_33 = arith.constant 0 : index
    %39 = memref.load %arg2[%c3_32, %c0_33] : memref<9x3xf32, #tpu.memory_space<smem>>
    %40 = vector.broadcast %39 : f32 to vector<2x8xf32>
    %41 = arith.select %38, %40, %36 : vector<2x8xi1>, vector<2x8xf32>
    %c4_i32 = arith.constant 4 : i32
    %42 = vector.broadcast %c4_i32 : i32 to vector<2x8xi32>
    %43 = arith.cmpi eq, %20, %42 : vector<2x8xi32>
    %c4_34 = arith.constant 4 : index
    %c0_35 = arith.constant 0 : index
    %44 = memref.load %arg2[%c4_34, %c0_35] : memref<9x3xf32, #tpu.memory_space<smem>>
    %45 = vector.broadcast %44 : f32 to vector<2x8xf32>
    %46 = arith.select %43, %45, %41 : vector<2x8xi1>, vector<2x8xf32>
    %c5_i32 = arith.constant 5 : i32
    %47 = vector.broadcast %c5_i32 : i32 to vector<2x8xi32>
    %48 = arith.cmpi eq, %20, %47 : vector<2x8xi32>
    %c5_36 = arith.constant 5 : index
    %c0_37 = arith.constant 0 : index
    %49 = memref.load %arg2[%c5_36, %c0_37] : memref<9x3xf32, #tpu.memory_space<smem>>
    %50 = vector.broadcast %49 : f32 to vector<2x8xf32>
    %51 = arith.select %48, %50, %46 : vector<2x8xi1>, vector<2x8xf32>
    %c6_i32 = arith.constant 6 : i32
    %52 = vector.broadcast %c6_i32 : i32 to vector<2x8xi32>
    %53 = arith.cmpi eq, %20, %52 : vector<2x8xi32>
    %c6 = arith.constant 6 : index
    %c0_38 = arith.constant 0 : index
    %54 = memref.load %arg2[%c6, %c0_38] : memref<9x3xf32, #tpu.memory_space<smem>>
    %55 = vector.broadcast %54 : f32 to vector<2x8xf32>
    %56 = arith.select %53, %55, %51 : vector<2x8xi1>, vector<2x8xf32>
    %c7_i32 = arith.constant 7 : i32
    %57 = vector.broadcast %c7_i32 : i32 to vector<2x8xi32>
    %58 = arith.cmpi eq, %20, %57 : vector<2x8xi32>
    %c7 = arith.constant 7 : index
    %c0_39 = arith.constant 0 : index
    %59 = memref.load %arg2[%c7, %c0_39] : memref<9x3xf32, #tpu.memory_space<smem>>
    %60 = vector.broadcast %59 : f32 to vector<2x8xf32>
    %61 = arith.select %58, %60, %56 : vector<2x8xi1>, vector<2x8xf32>
    %c8_i32 = arith.constant 8 : i32
    %62 = vector.broadcast %c8_i32 : i32 to vector<2x8xi32>
    %63 = arith.cmpi eq, %20, %62 : vector<2x8xi32>
    %c8 = arith.constant 8 : index
    %c0_40 = arith.constant 0 : index
    %64 = memref.load %arg2[%c8, %c0_40] : memref<9x3xf32, #tpu.memory_space<smem>>
    %65 = vector.broadcast %64 : f32 to vector<2x8xf32>
    %66 = arith.select %63, %65, %61 : vector<2x8xi1>, vector<2x8xf32>
    %67 = vector.shape_cast %66 : vector<2x8xf32> to vector<2x1x8xf32>
    %c0_41 = arith.constant 0 : index
    %c17 = arith.constant 17 : index
    %c0_42 = arith.constant 0 : index
    %68 = vector.load %arg10[%c0_41, %c17, %c0_42] : memref<2x20x8xf32, #tpu.memory_space<vmem>>, vector<2x1x8xf32>
    tpu.vector_store %arg10[%c0_41, %c17, %c0_42], %67 {strides = array<i32>} : memref<2x20x8xf32, #tpu.memory_space<vmem>>, vector<2x1x8xf32>,
    %cst_43 = arith.constant 0.000000e+00 : f32
    %69 = vector.broadcast %cst_43 : f32 to vector<2x8xf32>
    %c0_i32_44 = arith.constant 0 : i32
    %70 = vector.broadcast %c0_i32_44 : i32 to vector<2x8xi32>
    %71 = arith.cmpi eq, %20, %70 : vector<2x8xi32>
    %c0_45 = arith.constant 0 : index
    %c1_46 = arith.constant 1 : index
    %72 = memref.load %arg2[%c0_45, %c1_46] : memref<9x3xf32, #tpu.memory_space<smem>>
    %73 = vector.broadcast %72 : f32 to vector<2x8xf32>
    %74 = arith.select %71, %73, %69 : vector<2x8xi1>, vector<2x8xf32>
    %c1_i32_47 = arith.constant 1 : i32
    %75 = vector.broadcast %c1_i32_47 : i32 to vector<2x8xi32>
    %76 = arith.cmpi eq, %20, %75 : vector<2x8xi32>
    %c1_48 = arith.constant 1 : index
    %c1_49 = arith.constant 1 : index
    %77 = memref.load %arg2[%c1_48, %c1_49] : memref<9x3xf32, #tpu.memory_space<smem>>
    %78 = vector.broadcast %77 : f32 to vector<2x8xf32>
    %79 = arith.select %76, %78, %74 : vector<2x8xi1>, vector<2x8xf32>
    %c2_i32_50 = arith.constant 2 : i32
    %80 = vector.broadcast %c2_i32_50 : i32 to vector<2x8xi32>
    %81 = arith.cmpi eq, %20, %80 : vector<2x8xi32>
    %c2_51 = arith.constant 2 : index
    %c1_52 = arith.constant 1 : index
    %82 = memref.load %arg2[%c2_51, %c1_52] : memref<9x3xf32, #tpu.memory_space<smem>>
    %83 = vector.broadcast %82 : f32 to vector<2x8xf32>
    %84 = arith.select %81, %83, %79 : vector<2x8xi1>, vector<2x8xf32>
    %c3_i32_53 = arith.constant 3 : i32
    %85 = vector.broadcast %c3_i32_53 : i32 to vector<2x8xi32>
    %86 = arith.cmpi eq, %20, %85 : vector<2x8xi32>
    %c3_54 = arith.constant 3 : index
    %c1_55 = arith.constant 1 : index
    %87 = memref.load %arg2[%c3_54, %c1_55] : memref<9x3xf32, #tpu.memory_space<smem>>
    %88 = vector.broadcast %87 : f32 to vector<2x8xf32>
    %89 = arith.select %86, %88, %84 : vector<2x8xi1>, vector<2x8xf32>
    %c4_i32_56 = arith.constant 4 : i32
    %90 = vector.broadcast %c4_i32_56 : i32 to vector<2x8xi32>
    %91 = arith.cmpi eq, %20, %90 : vector<2x8xi32>
    %c4_57 = arith.constant 4 : index
    %c1_58 = arith.constant 1 : index
    %92 = memref.load %arg2[%c4_57, %c1_58] : memref<9x3xf32, #tpu.memory_space<smem>>
    %93 = vector.broadcast %92 : f32 to vector<2x8xf32>
    %94 = arith.select %91, %93, %89 : vector<2x8xi1>, vector<2x8xf32>
    %c5_i32_59 = arith.constant 5 : i32
    %95 = vector.broadcast %c5_i32_59 : i32 to vector<2x8xi32>
    %96 = arith.cmpi eq, %20, %95 : vector<2x8xi32>
    %c5_60 = arith.constant 5 : index
    %c1_61 = arith.constant 1 : index
    %97 = memref.load %arg2[%c5_60, %c1_61] : memref<9x3xf32, #tpu.memory_space<smem>>
    %98 = vector.broadcast %97 : f32 to vector<2x8xf32>
    %99 = arith.select %96, %98, %94 : vector<2x8xi1>, vector<2x8xf32>
    %c6_i32_62 = arith.constant 6 : i32
    %100 = vector.broadcast %c6_i32_62 : i32 to vector<2x8xi32>
    %101 = arith.cmpi eq, %20, %100 : vector<2x8xi32>
    %c6_63 = arith.constant 6 : index
    %c1_64 = arith.constant 1 : index
    %102 = memref.load %arg2[%c6_63, %c1_64] : memref<9x3xf32, #tpu.memory_space<smem>>
    %103 = vector.broadcast %102 : f32 to vector<2x8xf32>
    %104 = arith.select %101, %103, %99 : vector<2x8xi1>, vector<2x8xf32>
    %c7_i32_65 = arith.constant 7 : i32
    %105 = vector.broadcast %c7_i32_65 : i32 to vector<2x8xi32>
    %106 = arith.cmpi eq, %20, %105 : vector<2x8xi32>
    %c7_66 = arith.constant 7 : index
    %c1_67 = arith.constant 1 : index
    %107 = memref.load %arg2[%c7_66, %c1_67] : memref<9x3xf32, #tpu.memory_space<smem>>
    %108 = vector.broadcast %107 : f32 to vector<2x8xf32>
    %109 = arith.select %106, %108, %104 : vector<2x8xi1>, vector<2x8xf32>
    %c8_i32_68 = arith.constant 8 : i32
    %110 = vector.broadcast %c8_i32_68 : i32 to vector<2x8xi32>
    %111 = arith.cmpi eq, %20, %110 : vector<2x8xi32>
    %c8_69 = arith.constant 8 : index
    %c1_70 = arith.constant 1 : index
    %112 = memref.load %arg2[%c8_69, %c1_70] : memref<9x3xf32, #tpu.memory_space<smem>>
    %113 = vector.broadcast %112 : f32 to vector<2x8xf32>
    %114 = arith.select %111, %113, %109 : vector<2x8xi1>, vector<2x8xf32>
    %115 = vector.shape_cast %114 : vector<2x8xf32> to vector<2x1x8xf32>
    %c0_71 = arith.constant 0 : index
    %c18 = arith.constant 18 : index
    %c0_72 = arith.constant 0 : index
    %116 = vector.load %arg10[%c0_71, %c18, %c0_72] : memref<2x20x8xf32, #tpu.memory_space<vmem>>, vector<2x1x8xf32>
    tpu.vector_store %arg10[%c0_71, %c18, %c0_72], %115 {strides = array<i32>} : memref<2x20x8xf32, #tpu.memory_space<vmem>>, vector<2x1x8xf32>,
    %cst_73 = arith.constant 0.000000e+00 : f32
    %117 = vector.broadcast %cst_73 : f32 to vector<2x8xf32>
    %c0_i32_74 = arith.constant 0 : i32
    %118 = vector.broadcast %c0_i32_74 : i32 to vector<2x8xi32>
    %119 = arith.cmpi eq, %20, %118 : vector<2x8xi32>
    %c0_75 = arith.constant 0 : index
    %c2_76 = arith.constant 2 : index
    %120 = memref.load %arg2[%c0_75, %c2_76] : memref<9x3xf32, #tpu.memory_space<smem>>
    %121 = vector.broadcast %120 : f32 to vector<2x8xf32>
    %122 = arith.select %119, %121, %117 : vector<2x8xi1>, vector<2x8xf32>
    %c1_i32_77 = arith.constant 1 : i32
    %123 = vector.broadcast %c1_i32_77 : i32 to vector<2x8xi32>
    %124 = arith.cmpi eq, %20, %123 : vector<2x8xi32>
    %c1_78 = arith.constant 1 : index
    %c2_79 = arith.constant 2 : index
    %125 = memref.load %arg2[%c1_78, %c2_79] : memref<9x3xf32, #tpu.memory_space<smem>>
    %126 = vector.broadcast %125 : f32 to vector<2x8xf32>
    %127 = arith.select %124, %126, %122 : vector<2x8xi1>, vector<2x8xf32>
    %c2_i32_80 = arith.constant 2 : i32
    %128 = vector.broadcast %c2_i32_80 : i32 to vector<2x8xi32>
    %129 = arith.cmpi eq, %20, %128 : vector<2x8xi32>
    %c2_81 = arith.constant 2 : index
    %c2_82 = arith.constant 2 : index
    %130 = memref.load %arg2[%c2_81, %c2_82] : memref<9x3xf32, #tpu.memory_space<smem>>
    %131 = vector.broadcast %130 : f32 to vector<2x8xf32>
    %132 = arith.select %129, %131, %127 : vector<2x8xi1>, vector<2x8xf32>
    %c3_i32_83 = arith.constant 3 : i32
    %133 = vector.broadcast %c3_i32_83 : i32 to vector<2x8xi32>
    %134 = arith.cmpi eq, %20, %133 : vector<2x8xi32>
    %c3_84 = arith.constant 3 : index
    %c2_85 = arith.constant 2 : index
    %135 = memref.load %arg2[%c3_84, %c2_85] : memref<9x3xf32, #tpu.memory_space<smem>>
    %136 = vector.broadcast %135 : f32 to vector<2x8xf32>
    %137 = arith.select %134, %136, %132 : vector<2x8xi1>, vector<2x8xf32>
    %c4_i32_86 = arith.constant 4 : i32
    %138 = vector.broadcast %c4_i32_86 : i32 to vector<2x8xi32>
    %139 = arith.cmpi eq, %20, %138 : vector<2x8xi32>
    %c4_87 = arith.constant 4 : index
    %c2_88 = arith.constant 2 : index
    %140 = memref.load %arg2[%c4_87, %c2_88] : memref<9x3xf32, #tpu.memory_space<smem>>
    %141 = vector.broadcast %140 : f32 to vector<2x8xf32>
    %142 = arith.select %139, %141, %137 : vector<2x8xi1>, vector<2x8xf32>
    %c5_i32_89 = arith.constant 5 : i32
    %143 = vector.broadcast %c5_i32_89 : i32 to vector<2x8xi32>
    %144 = arith.cmpi eq, %20, %143 : vector<2x8xi32>
    %c5_90 = arith.constant 5 : index
    %c2_91 = arith.constant 2 : index
    %145 = memref.load %arg2[%c5_90, %c2_91] : memref<9x3xf32, #tpu.memory_space<smem>>
    %146 = vector.broadcast %145 : f32 to vector<2x8xf32>
    %147 = arith.select %144, %146, %142 : vector<2x8xi1>, vector<2x8xf32>
    %c6_i32_92 = arith.constant 6 : i32
    %148 = vector.broadcast %c6_i32_92 : i32 to vector<2x8xi32>
    %149 = arith.cmpi eq, %20, %148 : vector<2x8xi32>
    %c6_93 = arith.constant 6 : index
    %c2_94 = arith.constant 2 : index
    %150 = memref.load %arg2[%c6_93, %c2_94] : memref<9x3xf32, #tpu.memory_space<smem>>
    %151 = vector.broadcast %150 : f32 to vector<2x8xf32>
    %152 = arith.select %149, %151, %147 : vector<2x8xi1>, vector<2x8xf32>
    %c7_i32_95 = arith.constant 7 : i32
    %153 = vector.broadcast %c7_i32_95 : i32 to vector<2x8xi32>
    %154 = arith.cmpi eq, %20, %153 : vector<2x8xi32>
    %c7_96 = arith.constant 7 : index
    %c2_97 = arith.constant 2 : index
    %155 = memref.load %arg2[%c7_96, %c2_97] : memref<9x3xf32, #tpu.memory_space<smem>>
    %156 = vector.broadcast %155 : f32 to vector<2x8xf32>
    %157 = arith.select %154, %156, %152 : vector<2x8xi1>, vector<2x8xf32>
    %c8_i32_98 = arith.constant 8 : i32
    %158 = vector.broadcast %c8_i32_98 : i32 to vector<2x8xi32>
    %159 = arith.cmpi eq, %20, %158 : vector<2x8xi32>
    %c8_99 = arith.constant 8 : index
    %c2_100 = arith.constant 2 : index
    %160 = memref.load %arg2[%c8_99, %c2_100] : memref<9x3xf32, #tpu.memory_space<smem>>
    %161 = vector.broadcast %160 : f32 to vector<2x8xf32>
    %162 = arith.select %159, %161, %157 : vector<2x8xi1>, vector<2x8xf32>
    %163 = vector.shape_cast %162 : vector<2x8xf32> to vector<2x1x8xf32>
    %c0_101 = arith.constant 0 : index
    %c19 = arith.constant 19 : index
    %c0_102 = arith.constant 0 : index
    %164 = vector.load %arg10[%c0_101, %c19, %c0_102] : memref<2x20x8xf32, #tpu.memory_space<vmem>>, vector<2x1x8xf32>
    tpu.vector_store %arg10[%c0_101, %c19, %c0_102], %163 {strides = array<i32>} : memref<2x20x8xf32, #tpu.memory_space<vmem>>, vector<2x1x8xf32>,
    return
  }
  func.func @transform_0(%arg0: i32, %arg1: i32, %arg2: memref<9x3xf32, #tpu.memory_space<smem>>) -> (i32, i32) {
    %c0_i32 = arith.constant 0 : i32
    %c0_i32_0 = arith.constant 0 : i32
    return %arg0, %c0_i32 : i32, i32
  }
  func.func @transform_1(%arg0: i32, %arg1: i32, %arg2: memref<9x3xf32, #tpu.memory_space<smem>>) -> (i32, i32) {
    %c0_i32 = arith.constant 0 : i32
    return %arg0, %arg1 : i32, i32
  }
  func.func @transform_2(%arg0: i32, %arg1: i32, %arg2: memref<9x3xf32, #tpu.memory_space<smem>>) -> (i32, i32) {
    %c0_i32 = arith.constant 0 : i32
    return %arg0, %arg1 : i32, i32
  }
  func.func @transform_3(%arg0: i32, %arg1: i32, %arg2: memref<9x3xf32, #tpu.memory_space<smem>>) -> (i32, i32) {
    %c0_i32 = arith.constant 0 : i32
    return %arg0, %arg1 : i32, i32
  }
  func.func @transform_4(%arg0: i32, %arg1: i32, %arg2: memref<9x3xf32, #tpu.memory_space<smem>>) -> (i32, i32) {
    %c0_i32 = arith.constant 0 : i32
    return %arg0, %arg1 : i32, i32
  }
  func.func @transform_5(%arg0: i32, %arg1: i32, %arg2: memref<9x3xf32, #tpu.memory_space<smem>>) -> (i32, i32) {
    %c0_i32 = arith.constant 0 : i32
    return %arg0, %arg1 : i32, i32
  }
  func.func @transform_6(%arg0: i32, %arg1: i32, %arg2: memref<9x3xf32, #tpu.memory_space<smem>>) -> (i32, i32) {
    %c0_i32 = arith.constant 0 : i32
    return %arg0, %arg1 : i32, i32
  }
  func.func @transform_7(%arg0: i32, %arg1: i32, %arg2: memref<9x3xf32, #tpu.memory_space<smem>>) -> (i32, i32, i32) {
    %c0_i32 = arith.constant 0 : i32
    %c0_i32_0 = arith.constant 0 : i32
    return %arg0, %c0_i32, %arg1 : i32, i32, i32
  }
}

</mosaic_0001>

<bundles_post_ra>
// kernel: tpu_custom_call.1
= control target key start
LH: loop header
LB: loop body
LE: loop exit
PB: predicated region body
PF: predicated region fallthrough
CT: control target
= control target key end

     0   :  { %s254_s30 = smov [#allocation3]   ;;  %s531_s0 = inlined_call_operand.vmem [shape: f32[9,3], index: 0, kind: input, shape index: {}]   ;;  %s532_s1 = inlined_call_operand.vmem [shape: f32[2,12], index: 1, kind: input, shape index: {}]   ;;  %s533_s2 = inlined_call_operand.vmem [shape: f32[2,8], index: 2, kind: input, shape index: {}]   ;;  %s534_s3 = inlined_call_operand.vmem [shape: f32[2,8], index: 3, kind: input, shape index: {}]   ;;  %s535_s4 = inlined_call_operand.vmem [shape: f32[2,8], index: 4, kind: input, shape index: {}]   ;;  %s536_s5 = inlined_call_operand.vmem [shape: f32[2,8], index: 5, kind: input, shape index: {}]   ;;  %s537_s6 = inlined_call_operand.vmem [shape: f32[2,8], index: 6, kind: input, shape index: {}]   ;;  %s538_s7 = inlined_call_operand.vmem [shape: s32[2,8], index: 7, kind: input, shape index: {}]   ;;  %s539_s8 = inlined_call_operand.vmem [shape: f32[2,20,8], index: 8, kind: output, shape index: {}]  }
   0x1   :  { %s14_s29 = sshll.u32 %s531_s0, 4  ;;  %s15_s29 = int_to_ptr.vmem [resolvable:$true] %s14_s29 }
   0x2   :  { %17 = dma.vmem_to_smem %s15_s29, 256, %s254_s30, [#allocation2] }
   0x3   :  { %252 = dma.done.wait [#allocation2], 256 }
   0x4   :  { %253 = vsyncadd [#allocation2], 4294967040 }
   0x5   :  { %20 = sfence }
   0x6   :  { %v68_v0 = vlaneseq  ;;  %v66_v2 = vld [vmem:[%s532_s1] sm:$0x3]  ;;  %s101_s0 = sld [smem:[#allocation3]]  ;;  %vm39_vm8 = vcmask 57344   ;;  %vm93_vm10 = vcmask 64512   ;;  %vm95_vm11 = vcmask 60416  }
   0x7   :  { %v80_v3 = vperm.slane %v66_v2, 1  ;;  %v67_v4 = vperm.slane %v66_v2, 0  ;;  %s209_s11 = sld [smem:[#allocation3 + $0x80]]  ;;  %v329_v6 = vld [vmem:[%s538_s7] sm:$0x3] }
   0x8   :  { %v69_v1 = vshrl.u32 %v68_v0, 7  ;;  %s210_s12 = sld [smem:[#allocation3 + $0x100]]  ;;  %vm100_vm0 = vcmp.eq.s32.totalorder %v329_v6, 0  ;;  %vm104_vm1 = vcmp.eq.s32.totalorder %v329_v6, 1  ;;  %vm108_vm2 = vcmp.eq.s32.totalorder %v329_v6, 2 }
   0x9   :  { %s306_s13 = sld [smem:[#allocation3 + $0x180]]  ;;  %vm112_vm3 = vcmp.eq.s32.totalorder %v329_v6, 3  ;;  %vm116_vm4 = vcmp.eq.s32.totalorder %v329_v6, 4  ;;  %vm120_vm5 = vcmp.eq.s32.totalorder %v329_v6, 5  ;;  %vm124_vm6 = vcmp.eq.s32.totalorder %v329_v6, 6 }
   0xa   :  { %238 = vset.pattern.permute.xlu1 %v69_v1  ;;  %236 = vset.pattern.permute.xlu0 %v69_v1  ;;  %v76_v5 = vadd.s32 8, %v69_v1  ;;  %s308_s14 = sld [smem:[#allocation3 + $0x200]]  ;;  %vm128_vm7 = vcmp.eq.s32.totalorder %v329_v6, 7  ;;  %v35_v31 = vld [vmem:[%s533_s2] sm:$0x3]  ;;  %vm132_vm9 = vcmp.eq.s32.totalorder %v329_v6, 8 }
   0xb   :  { %s310_s15 = sld [smem:[#allocation3 + $0x280]]  ;;  %v42_v32 = vld [vmem:[%s534_s3] sm:$0x3]  ;;  %v37_v35 = vrot.slane %v35_v31, 1  ;;  %40 = vst.msk [vmem:[%s539_s8] sm:$0x1] %vm39_vm8, %v35_v31 }
   0xc   :  { %s312_s16 = sld [smem:[#allocation3 + $0x300]]  ;;  %v102_v7 = vstv %s101_s0  ;;  %v48_v36 = vld [vmem:[%s535_s4] sm:$0x3]  ;;  %v44_v39 = vrot.slane %v42_v32, 1  ;;  %46 = vst.msk [vmem:[%s539_s8 + $0x1] sm:$0x1] %vm39_vm8, %v42_v32 }
   0xd   :  { %s314_s1 = sld [smem:[#allocation3 + $0x380]]  ;;  %v103_v9 = vsel %vm100_vm0, %v102_v7, 0.0  ;;  %v106_v10 = vstv %s209_s11  ;;  %v54_v40 = vld [vmem:[%s536_s5] sm:$0x3]  ;;  %41 = vst.msk [vmem:[%s539_s8 + $0x18] sm:$0x1] %vm39_vm8, %v37_v35 }
   0xe   :  { %s217_s17 = sld [smem:[#allocation3 + $0x1]]  ;;  %v107_v12 = vsel %vm104_vm1, %v106_v10, %v103_v9  ;;  %v110_v13 = vstv %s210_s12  ;;  %v50_v46 = vrot.slane %v48_v36, 1  ;;  %v56_v50 = vrot.slane %v54_v40, 1  ;;  %v60_v51 = vld [vmem:[%s537_s6] sm:$0x3] }
   0xf   :  { %s316_s18 = sld [smem:[#allocation3 + $0x400]]  ;;  %v111_v15 = vsel %vm108_vm2, %v110_v13, %v107_v12  ;;  %v114_v16 = vstv %s306_s13  ;;  %47 = vst.msk [vmem:[%s539_s8 + $0x19] sm:$0x1] %vm39_vm8, %v44_v39  ;;  %v62_v62 = vrot.slane %v60_v51, 1 }
  0x10   :  { %s218_s19 = sld [smem:[#allocation3 + $0x81]]  ;;  %v115_v18 = vsel %vm112_vm3, %v114_v16, %v111_v15  ;;  %v118_v19 = vstv %s308_s14  ;;  %52 = vst.msk [vmem:[%s539_s8 + $0x2] sm:$0x1] %vm39_vm8, %v48_v36 }
  0x11   :  { %s318_s20 = sld [smem:[#allocation3 + $0x101]]  ;;  %v119_v21 = vsel %vm116_vm4, %v118_v19, %v115_v18  ;;  %v122_v22 = vstv %s310_s15  ;;  %53 = vst.msk [vmem:[%s539_s8 + $0x1a] sm:$0x1] %vm39_vm8, %v50_v46 }
  0x12   :  { %85 = vperm.xlu1 %238, %v80_v3   ;;  %72 = vperm.xlu0 %236, %v67_v4   ;;  %s320_s21 = sld [smem:[#allocation3 + $0x181]]  ;;  %v123_v24 = vsel %vm120_vm5, %v122_v22, %v119_v21  ;;  %v126_v25 = vstv %s312_s16  ;;  %58 = vst.msk [vmem:[%s539_s8 + $0x3] sm:$0x1] %vm39_vm8, %v54_v40 }
  0x13   :  { %s322_s22 = sld [smem:[#allocation3 + $0x201]]  ;;  %v127_v27 = vsel %vm124_vm6, %v126_v25, %v123_v24  ;;  %v130_v28 = vstv %s314_s1  ;;  %59 = vst.msk [vmem:[%s539_s8 + $0x1b] sm:$0x1] %vm39_vm8, %v56_v50 }
  0x14   :  { %s324_s23 = sld [smem:[#allocation3 + $0x281]]  ;;  %v142_v8 = vstv %s217_s17  ;;  %v131_v37 = vsel %vm128_vm7, %v130_v28, %v127_v27  ;;  %64 = vst.msk [vmem:[%s539_s8 + $0x4] sm:$0x1] %vm39_vm8, %v60_v51 }
  0x15   :  { %s331_s26 = sld [smem:[#allocation3 + $0x301]]  ;;  %v143_v11 = vsel %vm100_vm0, %v142_v8, 0.0  ;;  %v134_v43 = vstv %s316_s18  ;;  %65 = vst.msk [vmem:[%s539_s8 + $0x1c] sm:$0x1] %vm39_vm8, %v62_v62 }
  0x16   :  { %s334_s27 = sld [smem:[#allocation3 + $0x381]]  ;;  %v145_v14 = vstv %s218_s19  ;;  %v135_v59 = vsel %vm132_vm9, %v134_v43, %v131_v37 }
  0x17   :  { %s341_s7 = sld [smem:[#allocation3 + $0x401]]  ;;  %v146_v17 = vsel %vm104_vm1, %v145_v14, %v143_v11  ;;  %v148_v20 = vstv %s318_s20  ;;  %139 = vst.msk [vmem:[%s539_s8 + $0x11] sm:$0x1] %vm39_vm8, %v135_v59 }
  0x18   :  { %s346_s28 = sld [smem:[#allocation3 + $0x2]]  ;;  %v149_v23 = vsel %vm108_vm2, %v148_v20, %v146_v17  ;;  %v151_v26 = vstv %s320_s21 }
  0x19   :  { %s354_s29 = sld [smem:[#allocation3 + $0x82]]  ;;  %v152_v29 = vsel %vm112_vm3, %v151_v26, %v149_v23  ;;  %v154_v30 = vstv %s322_s22 }
  0x1a   :  { %239 = vset.pattern.permute.xlu1 %v76_v5  ;;  %237 = vset.pattern.permute.xlu0 %v76_v5  ;;  %s361_s30 = sld [smem:[#allocation3 + $0x102]]  ;;  %v155_v33 = vsel %vm116_vm4, %v154_v30, %v152_v29  ;;  %v157_v34 = vstv %s324_s23 }
  0x1b   :  { %s369_s9 = sld [smem:[#allocation3 + $0x182]]  ;;  %v158_v41 = vsel %vm120_vm5, %v157_v34, %v155_v33  ;;  %v160_v42 = vstv %s331_s26 }
  0x1c   :  { %s376_s10 = sld [smem:[#allocation3 + $0x202]]  ;;  %v161_v44 = vsel %vm124_vm6, %v160_v42, %v158_v41  ;;  %v163_v45 = vstv %s334_s27 }
  0x1d   :  { %s384_s0 = sld [smem:[#allocation3 + $0x282]]  ;;  %v164_v55 = vsel %vm128_vm7, %v163_v45, %v161_v44  ;;  %v166_v56 = vstv %s341_s7 }
  0x1e   :  { %s387_s11 = sld [smem:[#allocation3 + $0x302]]  ;;  %v174_v38 = vstv %s346_s28  ;;  %v167_v1 = vsel %vm132_vm9, %v166_v56, %v164_v55 }
  0x1f   :  { %s398_s16 = sld [smem:[#allocation3 + $0x382]]  ;;  %v175_v47 = vsel %vm100_vm0, %v174_v38, 0.0  ;;  %v177_v48 = vstv %s354_s29  ;;  %v169_v8 = vrot.slane %v167_v1, 1  ;;  %171 = vst.msk [vmem:[%s539_s8 + $0x12] sm:$0x1] %vm39_vm8, %v167_v1 }
  0x20   :  { %s412_s19 = sld [smem:[#allocation3 + $0x402]]  ;;  %v180_v49 = vstv %s361_s30  ;;  %v178_v52 = vsel %vm104_vm1, %v177_v48, %v175_v47 }
  0x21   :  { %v183_v53 = vstv %s369_s9  ;;  %v181_v57 = vsel %vm108_vm2, %v180_v49, %v178_v52  ;;  %172 = vst.msk [vmem:[%s539_s8 + $0x2a] sm:$0x1] %vm39_vm8, %v169_v8 }
  0x22   :  { %91 = vperm.xlu1 %239, %v80_v3   ;;  %78 = vperm.xlu0 %237, %v67_v4   ;;  %v186_v54 = vstv %s376_s10  ;;  %v184_v60 = vsel %vm112_vm3, %v183_v53, %v181_v57  ;;  %v137_v3 = vrot.slane %v135_v59, 1 }
  0x23   :  { %v189_v58 = vstv %s384_s0  ;;  %v187_v63 = vsel %vm116_vm4, %v186_v54, %v184_v60 }
  0x24   :  { %v192_v61 = vstv %s387_s11  ;;  %v190_v2 = vsel %vm120_vm5, %v189_v58, %v187_v63  ;;  %140 = vst.msk [vmem:[%s539_s8 + $0x29] sm:$0x1] %vm39_vm8, %v137_v3 }
  0x25   :  { %v195_v0 = vstv %s398_s16  ;;  %v193_v4 = vsel %vm124_vm6, %v192_v61, %v190_v2 }
  0x26   :  { %v198_v5 = vstv %s412_s19  ;;  %v196_v7 = vsel %vm128_vm7, %v195_v0, %v193_v4 }
  0x27   :  { %v199_v9 = vsel %vm132_vm9, %v198_v5, %v196_v7 }
  0x28   :  { %v201_v10 = vrot.slane %v199_v9, 1  ;;  %203 = vst.msk [vmem:[%s539_s8 + $0x13] sm:$0x1] %vm39_vm8, %v199_v9 }
  0x2a   :  { %204 = vst.msk [vmem:[%s539_s8 + $0x2b] sm:$0x1] %vm39_vm8, %v201_v10 }
  0x84   :  { %v86_v11 = vpop.permute.xlu1 %85  ;;  %v73_v6 = vpop.permute.xlu0 %72 }
  0x85   :  { %97 = vst.msk [vmem:[%s539_s8 + $0x1d] sm:$0xff] %vm93_vm10, %v86_v11 }
  0x86   :  { %94 = vst.msk [vmem:[%s539_s8 + $0x5] sm:$0xff] %vm93_vm10, %v73_v6 }
  0x94   :  { %v92_v12 = vpop.permute.xlu1 %91  ;;  %v79_v13 = vpop.permute.xlu0 %78 }
  0x95   :  { %98 = vst.msk [vmem:[%s539_s8 + $0x25] sm:$0xf] %vm95_vm11, %v92_v12 }
  0x96   :  { %96 = vst.msk [vmem:[%s539_s8 + $0xd] sm:$0xf] %vm95_vm11, %v79_v13 }

</bundles_post_ra>
